<compile_context>
chip_gen: v7x
topology: tpu7x:2x2x1
jax: 0.10.0
libtpu: 0.0.40
codegen_flags: <defaults>
</compile_context>

<pallas_src>
from functools import partial

import jax
import jax.numpy as jnp
import numpy as np
from jax import lax
from jax.experimental import pallas as pl
from jax.experimental.pallas import tpu as pltpu

DELTA = 0.1625
FREQ_SCALE = 0.325
MIN_LAYERS = 1
MAX_LAYERS = 5
EPS = 1e-12                      # F.normalize eps
REL_DTYPE = jnp.bfloat16         # MXU-native operand dtype; accumulation stays f32


def _round_up(x, m):
    return -(-x // m) * m


def _l2norm(x):
    # F.normalize(x, p=2, dim=-1): x / max(||x||_2, eps) == x * rsqrt(max(ss, eps^2))
    ss = jnp.sum(x * x, axis=-1, keepdims=True)
    return x * lax.rsqrt(jnp.maximum(ss, EPS * EPS))


def echo_kernel(emb_ref, rel_ref, layers_ref, *out_refs, delta, max_layers, track_init):
    """Echo refinement for a block of batch elements.

    emb_ref    : (bb, T, D)  input embeddings (any float dtype)
    rel_ref    : (bb, T, T)  relationship matrix, bf16
    layers_ref : (bb, T, 1)  int32 per-token echo budget
    out_refs   : (out,[init]) refined embeddings [+ initial normalized snapshot]
    """
    if track_init:
        out_ref, init_ref = out_refs
    else:
        (out_ref,) = out_refs

    x = _l2norm(emb_ref[...].astype(jnp.float32))            # [bb, T, D] f32
    if track_init:
        init_ref[...] = x.astype(init_ref.dtype)

    # shifts[i] = delta * sum_j rel[i,j] * (x[i] - x[j])
    #           = delta * (rowsum[i] * x[i] - (rel @ x)[i])
    # The diagonal contributes rel[i,i]*(x[i]-x[i]) = 0, so no off-diagonal
    # masking is needed. rel is read from VMEM exactly once (bf16) and used
    # for both the rowsum (f32 accumulation) and the MXU matmul.
    rel_bf = rel_ref[...]                                     # [bb, T, T] bf16
    rowsum = jnp.sum(rel_bf.astype(jnp.float32), axis=-1, keepdims=True)
    layers = layers_ref[...]                                  # [bb, T, 1] int32

    for l in range(max_layers):                               # unrolled, 5 iters
        agg = jnp.einsum("bij,bjd->bid", rel_bf, x.astype(rel_bf.dtype),
                         preferred_element_type=jnp.float32)
        upd = _l2norm(x + delta * (rowsum * x - agg))
        # Tokens past their echo budget are left untouched (PyTorch renormalizes
        # them with a zero shift, which is a numerical no-op on a unit vector).
        x = jnp.where(l < layers, upd, x)

    out_ref[...] = x.astype(out_ref.dtype)


def calculate_layers(frequencies):
    # torch.clamp(min + floor(freq * freq_scale), min, max).int()
    return jnp.clip(
        MIN_LAYERS + jnp.floor(frequencies * FREQ_SCALE), MIN_LAYERS, MAX_LAYERS
    ).astype(jnp.int32)


def _vmem_limits():
    """(vmem_limit_bytes, per-step working-set budget) derived from the chip."""
    try:
        phys = int(pltpu.get_tpu_info().vmem_capacity_bytes)
    except Exception:
        phys = 64 * 1024 * 1024          # conservative (v7x-sized) fallback
    limit = min((phys * 3) // 4, 96 * 1024 * 1024)   # ~48 MiB on v7x, 96 MiB on v5e/v6e
    budget = max(limit - 8 * 1024 * 1024, 8 * 1024 * 1024)
    return limit, budget


def _vmem_estimate(bb, T, D, io_bytes, n_out, rel_bufs=2):
    """Rough per-step VMEM working set (pipeline buffers + in-kernel temporaries)."""
    io = bb * (2 * T * D * io_bytes            # embeddings block (double-buffered)
               + rel_bufs * T * T * 2          # rel block (bf16, rel_bufs deep)
               + 2 * max(T, 8) * 128 * 4       # layers block (lane-padded int32)
               + 2 * n_out * T * D * io_bytes)  # output block(s), real dtype
    live = bb * (T * T * 4 + 6 * T * D * 4)    # f32 temporaries inside the body
    return io + live


def _pick_batch_block(B, T, D, io_bytes, n_out, budget):
    """Largest divisor of B that fits the VMEM budget while keeping >= min(B, 4)
    grid steps (so both v7x TensorCores are used and DMA can be pipelined)."""
    min_steps = min(B, 4)
    best = 1
    for bb in range(1, B + 1):
        if (B % bb == 0 and B // bb >= min_steps
                and _vmem_estimate(bb, T, D, io_bytes, n_out) <= budget):
            best = bb
    return best


class BasicEvolution:
    """Lazy 'basic' evolution: [0] is the initial normalized embeddings,
    [b+1] is the full-batch snapshot after batch element b finished refining.
    Built on demand (avoids O(B^2) HBM traffic in the wrapper)."""

    def __init__(self, norm_init, refined):
        self._norm_init = norm_init
        self._refined = refined
        self._len = int(refined.shape[0]) + 1

    def __len__(self):
        return self._len

    def __getitem__(self, i):
        if not isinstance(i, int):
            raise TypeError("BasicEvolution supports integer indexing only")
        if i < 0:
            i += self._len
        if not 0 <= i < self._len:
            raise IndexError(i)
        if i == 0:
            return self._norm_init
        if i == self._len - 1:
            return self._refined
        return jnp.concatenate([self._refined[:i], self._norm_init[i:]], axis=0)

    def materialize(self):
        return [self[i] for i in range(self._len)]


def echo_forward(embeddings, frequencies=None, relationship_matrix=None,
                 track_mode='basic'):
    """Matches EchoLayer.forward(track_mode='basic'); returns (refined, evolution).
    track_mode=None skips evolution tracking (drops the extra HBM writeback)."""
    if relationship_matrix is None:
        raise ValueError("relationship_matrix is required (as in the PyTorch module)")
    B, T, D = embeddings.shape

    if frequencies is None:
        echo_layers = jnp.full((B, T), MAX_LAYERS, dtype=jnp.int32)
    else:
        echo_layers = calculate_layers(frequencies)

    # Lane-dense padding: D -> multiple of 128 (unmasked stores, full MXU N),
    # T -> multiple of 8 (sublane). Padded tokens/lanes are exact zeros with a
    # zero echo budget, so they never influence (or receive) any shift.
    Tp, Dp = _round_up(T, 8), _round_up(D, 128)
    emb_p = embeddings
    if (Tp, Dp) != (T, D):
        emb_p = jnp.pad(embeddings, ((0, 0), (0, Tp - T), (0, Dp - D)))
    rel_p = relationship_matrix.astype(REL_DTYPE)
    if Tp != T:
        rel_p = jnp.pad(rel_p, ((0, 0), (0, Tp - T), (0, Tp - T)))
    layers_p = echo_layers
    if Tp != T:
        layers_p = jnp.pad(echo_layers, ((0, 0), (0, Tp - T)))
    layers_p = layers_p[:, :, None]                      # [B, Tp, 1] int32

    track_init = track_mode is not None
    n_out = 2 if track_init else 1
    itemsize = embeddings.dtype.itemsize

    vmem_limit, budget = _vmem_limits()
    bb = _pick_batch_block(B, Tp, Dp, itemsize, n_out, budget)
    grid = (B // bb,)

    # Triple-buffer the dominant (T^2) rel stream when there is headroom and
    # enough grid depth, to hide exposed HBM DMA behind the 5 matmuls.
    rel_kwargs = {}
    if grid[0] >= 3 and _vmem_estimate(bb, Tp, Dp, itemsize, n_out,
                                       rel_bufs=3) <= budget:
        rel_kwargs = dict(pipeline_mode=pl.Buffered(3))
    rel_spec = pl.BlockSpec((bb, Tp, Tp), lambda b: (b, 0, 0), **rel_kwargs)

    kernel = partial(echo_kernel, delta=DELTA, max_layers=MAX_LAYERS,
                     track_init=track_init)

    out_block = pl.BlockSpec((bb, Tp, Dp), lambda b: (b, 0, 0))
    if track_init:
        out_shape = (jax.ShapeDtypeStruct((B, Tp, Dp), embeddings.dtype),
                     jax.ShapeDtypeStruct((B, Tp, Dp), embeddings.dtype))
        out_specs = (out_block, out_block)
    else:
        out_shape = jax.ShapeDtypeStruct((B, Tp, Dp), embeddings.dtype)
        out_specs = out_block

    # TODO(synk): for very long sequences the (bb, Tp, Tp) rel block should be
    # K-tiled over its column dimension (mandatory well before Tp ~ 2048 on
    # v7x's 64 MiB VMEM); not needed at these sizes.
    result = pl.pallas_call(
        kernel,
        out_shape=out_shape,
        grid_spec=pltpu.PrefetchScalarGridSpec(
            num_scalar_prefetch=0,
            grid=grid,
            in_specs=[
                pl.BlockSpec((bb, Tp, Dp), lambda b: (b, 0, 0)),
                rel_spec,
                pl.BlockSpec((bb, Tp, 1), lambda b: (b, 0, 0)),
            ],
            out_specs=out_specs,
        ),
        compiler_params=pltpu.CompilerParams(
            dimension_semantics=("parallel",),
            vmem_limit_bytes=vmem_limit,
        ),
    )(emb_p, rel_p, layers_p)

    if track_init:
        refined_p, init_p = result
    else:
        refined_p, init_p = result, None

    refined = refined_p[:, :T, :D] if (Tp, Dp) != (T, D) else refined_p
    if not track_init:
        # TODO(synk): 'detailed' / 'tokenlevel' tracking and tune_parameters are
        # host-side bookkeeping / parameter search, not kernel compute.
        return refined, None

    norm_init = init_p[:, :T, :D] if (Tp, Dp) != (T, D) else init_p
    return refined, BasicEvolution(norm_init, refined)


def _reference(embeddings, frequencies, rel):
    """Pure-JAX f32 reference (same math, exact divide, f32 matmul)."""
    echo_layers = calculate_layers(frequencies)

    def norm(v):
        n = jnp.sqrt(jnp.sum(v * v, axis=-1, keepdims=True))
        return v / jnp.maximum(n, EPS)

    x = norm(embeddings.astype(jnp.float32))
    rel = rel.astype(jnp.float32)
    rowsum = jnp.sum(rel, axis=-1, keepdims=True)
    layers = echo_layers[:, :, None]
    for l in range(MAX_LAYERS):
        agg = jnp.einsum("bij,bjd->bid", rel, x)
        upd = norm(x + DELTA * (rowsum * x - agg))
        x = jnp.where(l < layers, upd, x)
    return x


if __name__ == "__main__":
    key = jax.random.PRNGKey(0)
    k1, k2, k3 = jax.random.split(key, 3)

    B, T, D = 2, 8, 32
    embeddings = jax.random.normal(k1, (B, T, D), dtype=jnp.float32)
    # frequencies spread over [0, 12] so echo_layers varies across 1..5
    frequencies = jax.random.uniform(k2, (B, T), dtype=jnp.float32,
                                     minval=0.0, maxval=12.0)
    rel = jax.random.uniform(k3, (B, T, T), dtype=jnp.float32)
    relationship_matrix = 0.5 * (rel + jnp.transpose(rel, (0, 2, 1)))

    refined, evolution = echo_forward(embeddings, frequencies, relationship_matrix)
    jax.block_until_ready(refined)
    jax.block_until_ready(evolution[0])
    jax.block_until_ready(evolution[-1])

    # bf16 matmul operands -> loose tolerance vs the exact-f32 reference.
    ref = _reference(embeddings, frequencies, relationship_matrix)
    np.testing.assert_allclose(np.asarray(refined), np.asarray(ref),
                               atol=3e-2, rtol=0)

    # evolution[0] must be the L2-normalized input.
    init_ref = embeddings / jnp.maximum(
        jnp.linalg.norm(embeddings, axis=-1, keepdims=True), EPS)
    np.testing.assert_allclose(np.asarray(evolution[0]), np.asarray(init_ref),
                               atol=1e-5, rtol=0)

    print("KERNEL_OK")
</pallas_src>

<mosaic_0001>
module attributes {stable_mosaic.version = 11 : i64} {
  func.func @echo_kernel(%arg0: i32, %arg1: memref<1x8x128xf32, #tpu.memory_space<vmem>>, %arg2: memref<1x8x8xbf16, #tpu.memory_space<vmem>>, %arg3: memref<1x8x1xi32, #tpu.memory_space<vmem>>, %arg4: memref<1x8x128xf32, #tpu.memory_space<vmem>>, %arg5: memref<1x8x128xf32, #tpu.memory_space<vmem>>) attributes {dimension_semantics = [#tpu.dimension_semantics<parallel>], iteration_bounds = array<i64: 2>, scalar_prefetch = 0 : i64, scratch_operands = 0 : i64, tpu.core_type = #tpu.core_type<tc>, window_params = [{transform_indices = @transform_0, window_bounds = array<i64: 1, 8, 128>}, {transform_indices = @transform_1, window_bounds = array<i64: 1, 8, 8>}, {transform_indices = @transform_2, window_bounds = array<i64: 1, 8, 1>}, {transform_indices = @transform_3, window_bounds = array<i64: 1, 8, 128>}, {transform_indices = @transform_4, window_bounds = array<i64: 1, 8, 128>}]} {
    %c0 = arith.constant 0 : index
    %c0_0 = arith.constant 0 : index
    %c0_1 = arith.constant 0 : index
    %0 = vector.load %arg1[%c0, %c0_0, %c0_1] : memref<1x8x128xf32, #tpu.memory_space<vmem>>, vector<1x8x128xf32>
    %1 = arith.mulf %0, %0 : vector<1x8x128xf32>
    %cst = arith.constant dense<0.000000e+00> : vector<1x8xf32>
    %2 = vector.multi_reduction <add>, %1, %cst [2] : vector<1x8x128xf32> to vector<1x8xf32>
    %3 = vector.shape_cast %2 : vector<1x8xf32> to vector<1x8x1xf32>
    %cst_2 = arith.constant 1.000000e-24 : f32
    %4 = vector.broadcast %cst_2 : f32 to vector<1x8x1xf32>
    %5 = arith.maximumf %3, %4 : vector<1x8x1xf32>
    %6 = math.rsqrt %5 : vector<1x8x1xf32>
    %7 = vector.broadcast %6 : vector<1x8x1xf32> to vector<1x8x128xf32>
    %8 = arith.mulf %0, %7 : vector<1x8x128xf32>
    %c0_3 = arith.constant 0 : index
    %c0_4 = arith.constant 0 : index
    %c0_5 = arith.constant 0 : index
    %9 = vector.load %arg5[%c0_3, %c0_4, %c0_5] : memref<1x8x128xf32, #tpu.memory_space<vmem>>, vector<1x8x128xf32>
    tpu.vector_store %arg5[%c0_3, %c0_4, %c0_5], %8 {strides = array<i32>} : memref<1x8x128xf32, #tpu.memory_space<vmem>>, vector<1x8x128xf32>,
    %c0_6 = arith.constant 0 : index
    %c0_7 = arith.constant 0 : index
    %c0_8 = arith.constant 0 : index
    %10 = vector.load %arg2[%c0_6, %c0_7, %c0_8] : memref<1x8x8xbf16, #tpu.memory_space<vmem>>, vector<1x8x8xbf16>
    %11 = arith.extf %10 : vector<1x8x8xbf16> to vector<1x8x8xf32>
    %cst_9 = arith.constant dense<0.000000e+00> : vector<1x8xf32>
    %12 = vector.multi_reduction <add>, %11, %cst_9 [2] : vector<1x8x8xf32> to vector<1x8xf32>
    %13 = vector.shape_cast %12 : vector<1x8xf32> to vector<1x8x1xf32>
    %c0_10 = arith.constant 0 : index
    %c0_11 = arith.constant 0 : index
    %c0_12 = arith.constant 0 : index
    %14 = vector.load %arg3[%c0_10, %c0_11, %c0_12] : memref<1x8x1xi32, #tpu.memory_space<vmem>>, vector<1x8x1xi32>
    %15 = arith.truncf %8 : vector<1x8x128xf32> to vector<1x8x128xbf16>
    "tpu.trace_start"() <{level = 10 : i32, message = "bij,bjd->bid"}> : () -> ()
    %cst_13 = arith.constant dense<0.000000e+00> : vector<1x8x128xf32>
    %16 = tpu.matmul %10, %15, %cst_13 {dimension_numbers = #tpu.dot_dimension_numbers<[2], [1], [1], [2], [0, 0, 0, 1, 1, 2], [0], [0]>} : vector<1x8x8xbf16>, vector<1x8x128xbf16>, vector<1x8x128xf32> -> vector<1x8x128xf32>
    "tpu.trace_stop"() : () -> ()
    %17 = vector.broadcast %13 : vector<1x8x1xf32> to vector<1x8x128xf32>
    %18 = arith.mulf %17, %8 : vector<1x8x128xf32>
    %19 = arith.subf %18, %16 : vector<1x8x128xf32>
    %cst_14 = arith.constant 1.625000e-01 : f32
    %20 = vector.broadcast %cst_14 : f32 to vector<1x8x128xf32>
    %21 = arith.mulf %20, %19 : vector<1x8x128xf32>
    %22 = arith.addf %8, %21 : vector<1x8x128xf32>
    %23 = arith.mulf %22, %22 : vector<1x8x128xf32>
    %cst_15 = arith.constant dense<0.000000e+00> : vector<1x8xf32>
    %24 = vector.multi_reduction <add>, %23, %cst_15 [2] : vector<1x8x128xf32> to vector<1x8xf32>
    %25 = vector.shape_cast %24 : vector<1x8xf32> to vector<1x8x1xf32>
    %cst_16 = arith.constant 1.000000e-24 : f32
    %26 = vector.broadcast %cst_16 : f32 to vector<1x8x1xf32>
    %27 = arith.maximumf %25, %26 : vector<1x8x1xf32>
    %28 = math.rsqrt %27 : vector<1x8x1xf32>
    %29 = vector.broadcast %28 : vector<1x8x1xf32> to vector<1x8x128xf32>
    %30 = arith.mulf %22, %29 : vector<1x8x128xf32>
    %c0_i32 = arith.constant 0 : i32
    %31 = vector.broadcast %c0_i32 : i32 to vector<1x8x1xi32>
    %32 = arith.cmpi sgt, %14, %31 : vector<1x8x1xi32>
    %33 = vector.shape_cast %32 : vector<1x8x1xi1> to vector<1x8x1xi1>
    %34 = vector.broadcast %33 : vector<1x8x1xi1> to vector<1x8x128xi1>
    %35 = arith.select %34, %30, %8 : vector<1x8x128xi1>, vector<1x8x128xf32>
    %36 = arith.truncf %35 : vector<1x8x128xf32> to vector<1x8x128xbf16>
    "tpu.trace_start"() <{level = 10 : i32, message = "bij,bjd->bid"}> : () -> ()
    %cst_17 = arith.constant dense<0.000000e+00> : vector<1x8x128xf32>
    %37 = tpu.matmul %10, %36, %cst_17 {dimension_numbers = #tpu.dot_dimension_numbers<[2], [1], [1], [2], [0, 0, 0, 1, 1, 2], [0], [0]>} : vector<1x8x8xbf16>, vector<1x8x128xbf16>, vector<1x8x128xf32> -> vector<1x8x128xf32>
    "tpu.trace_stop"() : () -> ()
    %38 = vector.broadcast %13 : vector<1x8x1xf32> to vector<1x8x128xf32>
    %39 = arith.mulf %38, %35 : vector<1x8x128xf32>
    %40 = arith.subf %39, %37 : vector<1x8x128xf32>
    %cst_18 = arith.constant 1.625000e-01 : f32
    %41 = vector.broadcast %cst_18 : f32 to vector<1x8x128xf32>
    %42 = arith.mulf %41, %40 : vector<1x8x128xf32>
    %43 = arith.addf %35, %42 : vector<1x8x128xf32>
    %44 = arith.mulf %43, %43 : vector<1x8x128xf32>
    %cst_19 = arith.constant dense<0.000000e+00> : vector<1x8xf32>
    %45 = vector.multi_reduction <add>, %44, %cst_19 [2] : vector<1x8x128xf32> to vector<1x8xf32>
    %46 = vector.shape_cast %45 : vector<1x8xf32> to vector<1x8x1xf32>
    %cst_20 = arith.constant 1.000000e-24 : f32
    %47 = vector.broadcast %cst_20 : f32 to vector<1x8x1xf32>
    %48 = arith.maximumf %46, %47 : vector<1x8x1xf32>
    %49 = math.rsqrt %48 : vector<1x8x1xf32>
    %50 = vector.broadcast %49 : vector<1x8x1xf32> to vector<1x8x128xf32>
    %51 = arith.mulf %43, %50 : vector<1x8x128xf32>
    %c1_i32 = arith.constant 1 : i32
    %52 = vector.broadcast %c1_i32 : i32 to vector<1x8x1xi32>
    %53 = arith.cmpi sgt, %14, %52 : vector<1x8x1xi32>
    %54 = vector.shape_cast %53 : vector<1x8x1xi1> to vector<1x8x1xi1>
    %55 = vector.broadcast %54 : vector<1x8x1xi1> to vector<1x8x128xi1>
    %56 = arith.select %55, %51, %35 : vector<1x8x128xi1>, vector<1x8x128xf32>
    %57 = arith.truncf %56 : vector<1x8x128xf32> to vector<1x8x128xbf16>
    "tpu.trace_start"() <{level = 10 : i32, message = "bij,bjd->bid"}> : () -> ()
    %cst_21 = arith.constant dense<0.000000e+00> : vector<1x8x128xf32>
    %58 = tpu.matmul %10, %57, %cst_21 {dimension_numbers = #tpu.dot_dimension_numbers<[2], [1], [1], [2], [0, 0, 0, 1, 1, 2], [0], [0]>} : vector<1x8x8xbf16>, vector<1x8x128xbf16>, vector<1x8x128xf32> -> vector<1x8x128xf32>
    "tpu.trace_stop"() : () -> ()
    %59 = vector.broadcast %13 : vector<1x8x1xf32> to vector<1x8x128xf32>
    %60 = arith.mulf %59, %56 : vector<1x8x128xf32>
    %61 = arith.subf %60, %58 : vector<1x8x128xf32>
    %cst_22 = arith.constant 1.625000e-01 : f32
    %62 = vector.broadcast %cst_22 : f32 to vector<1x8x128xf32>
    %63 = arith.mulf %62, %61 : vector<1x8x128xf32>
    %64 = arith.addf %56, %63 : vector<1x8x128xf32>
    %65 = arith.mulf %64, %64 : vector<1x8x128xf32>
    %cst_23 = arith.constant dense<0.000000e+00> : vector<1x8xf32>
    %66 = vector.multi_reduction <add>, %65, %cst_23 [2] : vector<1x8x128xf32> to vector<1x8xf32>
    %67 = vector.shape_cast %66 : vector<1x8xf32> to vector<1x8x1xf32>
    %cst_24 = arith.constant 1.000000e-24 : f32
    %68 = vector.broadcast %cst_24 : f32 to vector<1x8x1xf32>
    %69 = arith.maximumf %67, %68 : vector<1x8x1xf32>
    %70 = math.rsqrt %69 : vector<1x8x1xf32>
    %71 = vector.broadcast %70 : vector<1x8x1xf32> to vector<1x8x128xf32>
    %72 = arith.mulf %64, %71 : vector<1x8x128xf32>
    %c2_i32 = arith.constant 2 : i32
    %73 = vector.broadcast %c2_i32 : i32 to vector<1x8x1xi32>
    %74 = arith.cmpi sgt, %14, %73 : vector<1x8x1xi32>
    %75 = vector.shape_cast %74 : vector<1x8x1xi1> to vector<1x8x1xi1>
    %76 = vector.broadcast %75 : vector<1x8x1xi1> to vector<1x8x128xi1>
    %77 = arith.select %76, %72, %56 : vector<1x8x128xi1>, vector<1x8x128xf32>
    %78 = arith.truncf %77 : vector<1x8x128xf32> to vector<1x8x128xbf16>
    "tpu.trace_start"() <{level = 10 : i32, message = "bij,bjd->bid"}> : () -> ()
    %cst_25 = arith.constant dense<0.000000e+00> : vector<1x8x128xf32>
    %79 = tpu.matmul %10, %78, %cst_25 {dimension_numbers = #tpu.dot_dimension_numbers<[2], [1], [1], [2], [0, 0, 0, 1, 1, 2], [0], [0]>} : vector<1x8x8xbf16>, vector<1x8x128xbf16>, vector<1x8x128xf32> -> vector<1x8x128xf32>
    "tpu.trace_stop"() : () -> ()
    %80 = vector.broadcast %13 : vector<1x8x1xf32> to vector<1x8x128xf32>
    %81 = arith.mulf %80, %77 : vector<1x8x128xf32>
    %82 = arith.subf %81, %79 : vector<1x8x128xf32>
    %cst_26 = arith.constant 1.625000e-01 : f32
    %83 = vector.broadcast %cst_26 : f32 to vector<1x8x128xf32>
    %84 = arith.mulf %83, %82 : vector<1x8x128xf32>
    %85 = arith.addf %77, %84 : vector<1x8x128xf32>
    %86 = arith.mulf %85, %85 : vector<1x8x128xf32>
    %cst_27 = arith.constant dense<0.000000e+00> : vector<1x8xf32>
    %87 = vector.multi_reduction <add>, %86, %cst_27 [2] : vector<1x8x128xf32> to vector<1x8xf32>
    %88 = vector.shape_cast %87 : vector<1x8xf32> to vector<1x8x1xf32>
    %cst_28 = arith.constant 1.000000e-24 : f32
    %89 = vector.broadcast %cst_28 : f32 to vector<1x8x1xf32>
    %90 = arith.maximumf %88, %89 : vector<1x8x1xf32>
    %91 = math.rsqrt %90 : vector<1x8x1xf32>
    %92 = vector.broadcast %91 : vector<1x8x1xf32> to vector<1x8x128xf32>
    %93 = arith.mulf %85, %92 : vector<1x8x128xf32>
    %c3_i32 = arith.constant 3 : i32
    %94 = vector.broadcast %c3_i32 : i32 to vector<1x8x1xi32>
    %95 = arith.cmpi sgt, %14, %94 : vector<1x8x1xi32>
    %96 = vector.shape_cast %95 : vector<1x8x1xi1> to vector<1x8x1xi1>
    %97 = vector.broadcast %96 : vector<1x8x1xi1> to vector<1x8x128xi1>
    %98 = arith.select %97, %93, %77 : vector<1x8x128xi1>, vector<1x8x128xf32>
    %99 = arith.truncf %98 : vector<1x8x128xf32> to vector<1x8x128xbf16>
    "tpu.trace_start"() <{level = 10 : i32, message = "bij,bjd->bid"}> : () -> ()
    %cst_29 = arith.constant dense<0.000000e+00> : vector<1x8x128xf32>
    %100 = tpu.matmul %10, %99, %cst_29 {dimension_numbers = #tpu.dot_dimension_numbers<[2], [1], [1], [2], [0, 0, 0, 1, 1, 2], [0], [0]>} : vector<1x8x8xbf16>, vector<1x8x128xbf16>, vector<1x8x128xf32> -> vector<1x8x128xf32>
    "tpu.trace_stop"() : () -> ()
    %101 = vector.broadcast %13 : vector<1x8x1xf32> to vector<1x8x128xf32>
    %102 = arith.mulf %101, %98 : vector<1x8x128xf32>
    %103 = arith.subf %102, %100 : vector<1x8x128xf32>
    %cst_30 = arith.constant 1.625000e-01 : f32
    %104 = vector.broadcast %cst_30 : f32 to vector<1x8x128xf32>
    %105 = arith.mulf %104, %103 : vector<1x8x128xf32>
    %106 = arith.addf %98, %105 : vector<1x8x128xf32>
    %107 = arith.mulf %106, %106 : vector<1x8x128xf32>
    %cst_31 = arith.constant dense<0.000000e+00> : vector<1x8xf32>
    %108 = vector.multi_reduction <add>, %107, %cst_31 [2] : vector<1x8x128xf32> to vector<1x8xf32>
    %109 = vector.shape_cast %108 : vector<1x8xf32> to vector<1x8x1xf32>
    %cst_32 = arith.constant 1.000000e-24 : f32
    %110 = vector.broadcast %cst_32 : f32 to vector<1x8x1xf32>
    %111 = arith.maximumf %109, %110 : vector<1x8x1xf32>
    %112 = math.rsqrt %111 : vector<1x8x1xf32>
    %113 = vector.broadcast %112 : vector<1x8x1xf32> to vector<1x8x128xf32>
    %114 = arith.mulf %106, %113 : vector<1x8x128xf32>
    %c4_i32 = arith.constant 4 : i32
    %115 = vector.broadcast %c4_i32 : i32 to vector<1x8x1xi32>
    %116 = arith.cmpi sgt, %14, %115 : vector<1x8x1xi32>
    %117 = vector.shape_cast %116 : vector<1x8x1xi1> to vector<1x8x1xi1>
    %118 = vector.broadcast %117 : vector<1x8x1xi1> to vector<1x8x128xi1>
    %119 = arith.select %118, %114, %98 : vector<1x8x128xi1>, vector<1x8x128xf32>
    %c0_33 = arith.constant 0 : index
    %c0_34 = arith.constant 0 : index
    %c0_35 = arith.constant 0 : index
    %120 = vector.load %arg4[%c0_33, %c0_34, %c0_35] : memref<1x8x128xf32, #tpu.memory_space<vmem>>, vector<1x8x128xf32>
    tpu.vector_store %arg4[%c0_33, %c0_34, %c0_35], %119 {strides = array<i32>} : memref<1x8x128xf32, #tpu.memory_space<vmem>>, vector<1x8x128xf32>,
    return
  }
  func.func @transform_0(%arg0: i32) -> (i32, i32, i32) {
    %c0_i32 = arith.constant 0 : i32
    %c0_i32_0 = arith.constant 0 : i32
    %c0_i32_1 = arith.constant 0 : i32
    return %arg0, %c0_i32, %c0_i32_0 : i32, i32, i32
  }
  func.func @transform_1(%arg0: i32) -> (i32, i32, i32) {
    %c0_i32 = arith.constant 0 : i32
    %c0_i32_0 = arith.constant 0 : i32
    %c0_i32_1 = arith.constant 0 : i32
    return %arg0, %c0_i32, %c0_i32_0 : i32, i32, i32
  }
  func.func @transform_2(%arg0: i32) -> (i32, i32, i32) {
    %c0_i32 = arith.constant 0 : i32
    %c0_i32_0 = arith.constant 0 : i32
    %c0_i32_1 = arith.constant 0 : i32
    return %arg0, %c0_i32, %c0_i32_0 : i32, i32, i32
  }
  func.func @transform_3(%arg0: i32) -> (i32, i32, i32) {
    %c0_i32 = arith.constant 0 : i32
    %c0_i32_0 = arith.constant 0 : i32
    %c0_i32_1 = arith.constant 0 : i32
    return %arg0, %c0_i32, %c0_i32_0 : i32, i32, i32
  }
  func.func @transform_4(%arg0: i32) -> (i32, i32, i32) {
    %c0_i32 = arith.constant 0 : i32
    %c0_i32_0 = arith.constant 0 : i32
    %c0_i32_1 = arith.constant 0 : i32
    return %arg0, %c0_i32, %c0_i32_0 : i32, i32, i32
  }
}

</mosaic_0001>

<bundles_post_ra>
// kernel: tpu_custom_call.1
= control target key start
LH: loop header
LB: loop body
LE: loop exit
PB: predicated region body
PF: predicated region fallthrough
CT: control target
= control target key end

     0   :  { %10 = vsyncpa [#allocation3], 0  ;;  %s1286_s0 = inlined_call_operand.vmem [shape: f32[2,8,128], index: 0, kind: input, shape index: {}]   ;;  %s1287_s1 = inlined_call_operand.hbm [shape: bf16[2,8,8], index: 1, kind: input, shape index: {}]   ;;  %s1288_s2 = inlined_call_operand.vmem [shape: s32[2,8,1], index: 2, kind: input, shape index: {}]   ;;  %s1289_s3 = inlined_call_operand.hbm [shape: f32[2,8,128], index: 3, kind: output, shape index: {0}]   ;;  %s1290_s4 = inlined_call_operand.hbm [shape: f32[2,8,128], index: 4, kind: output, shape index: {1}]  }
   0x1   :  { %12 = vsyncpa [#allocation3 + $0x1], 0 }
   0x2   :  { %13 = vsyncpa [#allocation4], 0 }
   0x3   :  { %15 = vsyncpa [#allocation4 + $0x1], 0 }
   0x4   :  { %16 = vsyncpa [#allocation7], 0 }
   0x5   :  { %18 = vsyncpa [#allocation7 + $0x1], 0  ;;  %s1033_s15 = smov 0   ;;  %s1035_s16 = smov 0  }
   0x6   :  { %s1037_s17 = smov 0   ;;  %s1039_s18 = smov 0  }
   0x7 LB: > { %s1054_s19 = sadd.s32 4294967295, %s1000_s18   ;;  %s742_s20 = sadd.s32 4294967294, %s1000_s18   ;;  %s1000_s18 = sphi %s1039_s18, %s1305_s18   ;;  %s996_s17 = sphi %s1037_s17, %s1304_s17   ;;  %s992_s16 = sphi %s1035_s16, %s1303_s16   ;;  %s988_s15 = sphi %s1033_s15, %s1302_s15  }
   0x8   : > { %s1058_s21 = sadd.s32 1, %s1000_s18   ;;  %s57_s22 = sadd.s32 1, %s996_s17 }
   0x9   : > { %s54_s23 = ssub.s32 %s1000_s18, %s1058_s21  ;;  %p64_p0 = scmp.ne.s32.totalorder %s996_s17, %s992_s16 }
   0xa   : > { %p55_p1 = scmp.eq.s32.totalorder %s54_s23, 0  ;;  %p65_p2 = scmp.eq.s32.totalorder %s1000_s18, 0 }
   0xb   : > { %p70_p3 = scmp.ne.s32.totalorder %s992_s16, %s988_s15  ;;  %p71_p4 = scmp.eq.s32.totalorder %s1054_s19, 0 }
   0xc   : > { %s1070_s24 = scalar_select %p55_p1, %s996_s17, %s57_s22  }
   0xd   : > { %p1072_p5 = por %p65_p2, %p64_p0  ;;  %p1076_p6 = por %p71_p4, %p70_p3 }
   0xe   : > { %p120_p7 = scmp.eq.s32.totalorder %s1054_s19, 1  ;;  %p126_p8 = scmp.eq.s32.totalorder %s742_s20, 1 }
   0xf   : > { %p821_p10 = scmp.lt.s32.totalorder %s1000_s18, 2  ;;  %s179_s29 = sand.u32 1, %s996_s17  }
  0x10   : > { %p1083_p11 = por %p120_p7, %p64_p0  ;;  %p1087_p12 = por %p126_p8, %p70_p3 }
  0x11   : > { %s746_s30 = sshll.u32 %s1000_s18, 6  ;;  %s745_s5 = sshll.u32 %s179_s29, 2 }
  0x12   : > { %s1294_s27 = scalar_select %p1083_p11, 1, 0 }
  0x13   : > { %s1295_s28 = scalar_select %p1087_p12, 1, 0 }
  0x14   : > { %s1096_s8 = scalar_lea.hbm %s1287_s1, %s746_s30  ;;  %s183_s9 = scalar_lea.vmem [#allocation2], %s745_s5 }
  0x15   : > { %s190_s10 = sshll.u32 %s183_s9, 4  ;;  %p1100_p13 = pnand %p821_p10, %p1072_p5  ;;  %s1104_s10 = int_to_ptr.vmem [resolvable:$true] %s190_s10 }
  0x16   : > { %s180_s12 = scalar_lea.sflag [#allocation3], %s179_s29  ;;  %s872_s13 = scalar_lea.hbm %s1096_s8, 64 }
  0x17   : > { %p873_p2 = scmp.ne.s32.totalorder %s1096_s8, %s872_s13  ;;  %p874_p3 = pneg %p1100_p13 }
  0x18   : > { %s877_s22 = scalar_lea.hbm %s1287_s1, 128  ;;  %p878_p5 = scmp.lt.u32.totalorder %s1096_s8, %s1287_s1 }
  0x19   : > { %p875_p4 = pnand %p874_p3, %p873_p2  ;;  %p879_p8 = scmp.lt.u32.totalorder %s877_s22, %s872_s13 }
  0x1a   : > { %p881_p9 = scmp.lt.u32.totalorder %s872_s13, %s1096_s8 }
  0x1b   : > { %p876_p7 = pneg %p875_p4  ;;  %p880_p10 = por %p879_p8, %p878_p5 }
  0x1d   : > { %p882_p0 = por %p881_p9, %p880_p10 }
  0x1f   : > { %p883_p1 = pnand %p882_p0, %p876_p7 }
  0x21   : > { %886 = shalt.err (!%p883_p1)
}
  0x22   : > { %s887_s29 = scalar_lea.vmem %s1104_s10, 64  ;;  %s1002_s30 = smov [#allocation2]  }
  0x23   : > { %p888_p2 = scmp.ne.s32.totalorder %s1104_s10, %s887_s29  ;;  %s892_s5 = sshll.u32 %s1002_s30, 4  ;;  %s893_s5 = int_to_ptr.vmem [resolvable:$false] %s892_s5 }
  0x24   : > { %s894_s6 = scalar_lea.vmem %s893_s5, 128  ;;  %p895_p11 = scmp.lt.s32.totalorder %s1104_s10, %s893_s5 }
  0x25   : > { %p890_p4 = pnand %p888_p2, %p874_p3  ;;  %p896_p5 = scmp.lt.s32.totalorder %s894_s6, %s887_s29 }
  0x27   : > { %p891_p12 = pneg %p890_p4  ;;  %p897_p8 = por %p896_p5, %p895_p11 }
  0x29   : > { %p898_p9 = pnand %p897_p8, %p891_p12 }
  0x2b   : > { %901 = shalt.err (!%p898_p9)
}
  0x2c   : > { %813 = dma.hbm_to_vmem [thread:$0]  (!%p1100_p13), %s1096_s8, 64, %s1104_s10, %s180_s12  }
  0x2d   : > { %p1297_p0 = scmp.lt.s32.totalorder %s1000_s18, 3  ;;  %p1298_p1 = scmp.ge.s32.totalorder %s1000_s18, 1 }
  0x2f   : > { %p203_p3 = pnand %p1298_p1, %p1297_p0 }
  0x30   : > { %s1138_s7 = sand.u32 (!%p203_p3), 1, %s992_s16  }
  0x31   : > { %206 = sbr.rel (%p203_p3) target bundleno = 2157 (0x86d), region = 32  ;;  %s748_s9 = sshll.u32 (!%p203_p3), %s1138_s7, 2 }
  0x32   : > { %s209_s13 = scalar_lea.sflag (!%p203_p3), [#allocation3], %s1138_s7  ;;  %s212_s14 = scalar_lea.vmem (!%p203_p3), [#allocation2], %s748_s9 }
  0x38   : > { %975 = dma.done.wait (%p1076_p6), %s209_s13, 64  }
  0x39   : > { %977 = vsyncadd (%p1076_p6), %s209_s13, 4294967232  ;;  %p250_p11 = scmp.lt.s32.totalorder %s1054_s19, 1  ;;  %v1156_v1 = vld [vmem:[%s212_s14] sm:$0xf]  ;;  %vm269_vm0 = vcmask 64512   ;;  %v1003_v5 = vmov 0.0  }
  0x3a   : > { %v268_v3 = vunpack.c.l.bf16 %v1156_v1  ;;  %774 = vmatprep.subr.bf16.mxu0 %v1003_v5  ;;  %780 = vmatprep.subr.bf16.mxu1 %v1003_v5  ;;  %vm1004_vm1 = vmmov 0   ;;  %s749_s26 = sshll.u32 %s1138_s7, 3  ;;  %vm278_vm2 = vcmask 1043456   ;;  %v1005_v12 = vmov 0   ;;  %s760_s30 = sshll.u32 %s1054_s19, 7 }
  0x3b   : > { %s1148_s8 = scalar_select %p250_p11, %s1054_s19, 1  ;;  %776 = vmatprep.mubr.msk.bf16.mxu0 %vm1004_vm1, %v1003_v5  ;;  %782 = vmatprep.mubr.msk.bf16.mxu1 %vm1004_vm1, %v1003_v5 }
  0x3c   : > { %v270_v4 = vsel %vm269_vm0, %v268_v3, 0.0  ;;  %s1169_s22 = scalar_lea.vmem [#allocation6], %s749_s26  ;;  %858 = vset.pattern.permute.xlu1 %v1005_v12  ;;  %859 = vset.pattern.permute.xlu0 %v1005_v12  ;;  %s1214_s9 = scalar_lea.hbm %s1290_s4, %s760_s30 }
  0x3d   : > { %s751_s10 = sshll.u32 %s1148_s8, 3  ;;  %s616_s13 = sshll.u32 %s1169_s22, 4  ;;  %s617_s13 = int_to_ptr.vmem [resolvable:$true] %s616_s13 }
  0x3e   : > { %s253_s20 = scalar_lea.vmem %s1286_s0, %s751_s10  ;;  %s257_s29 = scalar_lea.vmem %s1288_s2, %s751_s10 }
  0x3f   : > { %v259_v0 = vld [vmem:[%s253_s20] sm:$0xff]  ;;  %s590_s14 = scalar_lea.sflag [#allocation7], %s1138_s7  ;;  %s902_s8 = scalar_lea.vmem %s617_s13, 128 }
  0x40   : > { %v260_v2 = vmul.f32 %v259_v0, %v259_v0  ;;  %v273_v23 = vld [vmem:[%s257_s29] sm:$0xff]  ;;  %p903_p6 = scmp.ne.s32.totalorder %s617_s13, %s902_s8  ;;  %p1299_p12 = scmp.ne.s32.totalorder %s1294_s27, 0 }
  0x41   : > { %vm332_vm3 = vcmp.gt.s32.totalorder %v273_v23, 0  ;;  %vm393_vm5 = vcmp.gt.s32.totalorder %v273_v23, 1  ;;  %vm454_vm6 = vcmp.gt.s32.totalorder %v273_v23, 2  ;;  %vm515_vm7 = vcmp.gt.s32.totalorder %v273_v23, 3  ;;  %s1006_s10 = smov [#allocation6]  }
  0x42   : > { %261 = vadd.xlane.f32.xlu0 %v260_v2  ;;  %v333_v24 = vsel %vm332_vm3, 1, %v1005_v12  ;;  %v394_v42 = vsel %vm393_vm5, 1, %v1005_v12  ;;  %v455_v43 = vsel %vm454_vm6, 1, %v1005_v12  ;;  %v516_v44 = vsel %vm515_vm7, 1, %v1005_v12  ;;  %p904_p13 = pnand %p903_p6, %p1299_p12  ;;  %s906_s11 = sshll.u32 %s1006_s10, 4  ;;  %s907_s11 = int_to_ptr.vmem [resolvable:$false] %s906_s11 }
  0x43   : > { %vm576_vm8 = vcmp.gt.s32.totalorder %v273_v23, 4  ;;  %s908_s12 = scalar_lea.vmem %s907_s11, 256  ;;  %p909_p10 = scmp.lt.s32.totalorder %s617_s13, %s907_s11 }
  0x44   : > { %v577_v45 = vsel %vm576_vm8, 1, %v1005_v12  ;;  %p905_p7 = pneg %p904_p13  ;;  %p910_p2 = scmp.lt.s32.totalorder %s908_s12, %s902_s8 }
  0x46   : > { %271 = vadd.xlane.f32.xlu0 %v270_v4  ;;  %p911_p4 = por %p910_p2, %p909_p10 }
  0x48   : > { %p912_p5 = pnand %p911_p4, %p905_p7 }
  0xcf   : > { %v262_v6 = vpop.xlane.xlu0 %261 }
  0xd0   : > { %v263_v7 = vmax.f32 %v262_v6, 1e-24 }
  0xd2   : > { %860 = vrsqrt.f32 %v263_v7 }
  0xd3   : > { %v1178_v13 = vpop.xlane.xlu0 %271 }
  0xdc   : > { %v861_v8 = vpop.eup %860 }
  0xdd   : > { %v265_v9 = vmul.f32 %v861_v8, %v259_v0 }
  0xdf   : > { %v274_v10 = vpack.c.bf16 %v265_v9, %v265_v9  ;;  %266 = vst [vmem:[%s1169_s22] sm:$0xff] %v265_v9  ;;  %v322_v14 = vmul.f32 %v1178_v13, %v265_v9 }
  0xe1   : > { %v280_v11 = vsel %vm278_vm2, %v274_v10, 0 }
  0xe2   : > { %775 = vmatpush3.bf16.msra.mxu0 %v280_v11 }
  0xe3   : > { %786 = vmatprep.subr.bf16.mxu0 %v1003_v5 }
  0xe5   : > { %777 = vmatmul.mubr.msk.bf16.vlgmr.msra.gmra.mrb[0].mxu0 %vm269_vm0, %v1156_v1 }
  0xe6   : > { %788 = vmatprep.mubr.msk.bf16.mxu0 %vm1004_vm1, %v1003_v5 }
 0x1b8   : > { %v316_v15 = vpop.f32.mrb[0].mxu0 }
 0x1b9   : > { %v323_v16 = vsub.f32 %v322_v14, %v316_v15  ;;  %v778_v17 = vpop.f32.mrb[1].mxu0 }
 0x1ba   : > { %v319_v18 = vpop.f32.mrb[2].mxu0 }
 0x1bb   : > { %v324_v19 = vmul.f32 0.1625, %v323_v16  ;;  %v779_v20 = vpop.f32.mrb[3].mxu0 }
 0x1bd   : > { %v325_v21 = vadd.f32 %v324_v19, %v265_v9 }
 0x1bf   : > { %v326_v22 = vmul.f32 %v325_v21, %v325_v21 }
 0x1c1   : > { %327 = vadd.xlane.f32.xlu1 %v326_v22 }
 0x1d2   : > { %335 = vperm.xlu1 %858, %v333_v24  }
 0x24e   : > { %v328_v25 = vpop.xlane.xlu1 %327 }
 0x24f   : > { %v329_v26 = vmax.f32 %v328_v25, 1e-24 }
 0x251   : > { %862 = vrsqrt.f32 %v329_v26 }
 0x252   : > { %v336_v27 = vpop.permute.xlu1 %335 }
 0x253   : > { %vm337_vm4 = vcmp.eq.s32.totalorder %v336_v27, 1 }
 0x25b   : > { %v863_v28 = vpop.eup %862 }
 0x25c   : > { %v331_v29 = vmul.f32 %v863_v28, %v325_v21 }
 0x25e   : > { %v338_v30 = vsel %vm337_vm4, %v331_v29, %v265_v9 }
 0x25f   : > { %v339_v31 = vpack.c.bf16 %v338_v30, %v338_v30  ;;  %v383_v33 = vmul.f32 %v338_v30, %v1178_v13 }
 0x261   : > { %v341_v32 = vsel %vm278_vm2, %v339_v31, 0 }
 0x262   : > { %781 = vmatpush3.bf16.msra.mxu1 %v341_v32 }
 0x263   : > { %792 = vmatprep.subr.bf16.mxu1 %v1003_v5 }
 0x265   : > { %783 = vmatmul.mubr.msk.bf16.vlgmr.msra.gmra.mrb[0].mxu1 %vm269_vm0, %v1156_v1 }
 0x266   : > { %794 = vmatprep.mubr.msk.bf16.mxu1 %vm1004_vm1, %v1003_v5 }
 0x338   : > { %v377_v34 = vpop.f32.mrb[0].mxu1 }
 0x339   : > { %v384_v35 = vsub.f32 %v383_v33, %v377_v34  ;;  %v784_v36 = vpop.f32.mrb[1].mxu1 }
 0x33a   : > { %v380_v37 = vpop.f32.mrb[2].mxu1 }
 0x33b   : > { %v385_v38 = vmul.f32 0.1625, %v384_v35  ;;  %v785_v39 = vpop.f32.mrb[3].mxu1 }
 0x33d   : > { %v386_v40 = vadd.f32 %v385_v38, %v338_v30 }
 0x33f   : > { %v387_v41 = vmul.f32 %v386_v40, %v386_v40 }
 0x341   : > { %388 = vadd.xlane.f32.xlu0 %v387_v41 }
 0x357   : > { %396 = vperm.xlu0 %859, %v394_v42  }
 0x35b   : > { %457 = vperm.xlu0 %859, %v455_v43  }
 0x35f   : > { %518 = vperm.xlu0 %859, %v516_v44  }
 0x363   : > { %579 = vperm.xlu0 %859, %v577_v45  }
 0x3ce   : > { %v389_v46 = vpop.xlane.xlu0 %388 }
 0x3cf   : > { %v390_v47 = vmax.f32 %v389_v46, 1e-24 }
 0x3d1   : > { %864 = vrsqrt.f32 %v390_v47 }
 0x3d6   : > { %v397_v48 = vpop.permute.xlu0 %396 }
 0x3d7   : > { %vm398_vm9 = vcmp.eq.s32.totalorder %v397_v48, 1 }
 0x3da   : > { %v458_v3 = vpop.permute.xlu0 %457 }
 0x3db   : > { %v865_v49 = vpop.eup %864  ;;  %vm459_vm10 = vcmp.eq.s32.totalorder %v458_v3, 1 }
 0x3dc   : > { %v392_v50 = vmul.f32 %v865_v49, %v386_v40 }
 0x3de   : > { %v399_v51 = vsel %vm398_vm9, %v392_v50, %v338_v30  ;;  %v519_v20 = vpop.permute.xlu0 %518 }
 0x3df   : > { %v400_v52 = vpack.c.bf16 %v399_v51, %v399_v51  ;;  %v444_v54 = vmul.f32 %v399_v51, %v1178_v13  ;;  %vm520_vm11 = vcmp.eq.s32.totalorder %v519_v20, 1 }
 0x3e1   : > { %v402_v53 = vsel %vm278_vm2, %v400_v52, 0 }
 0x3e2   : > { %787 = vmatpush3.bf16.msra.mxu0 %v402_v53 }
 0x3e3   : > { %798 = vmatprep.subr.bf16.mxu0 %v1003_v5 }
 0x3e5   : > { %789 = vmatmul.mubr.msk.bf16.vlgmr.msra.gmra.mrb[4].mxu0 %vm269_vm0, %v1156_v1 }
 0x3e6   : > { %800 = vmatprep.mubr.msk.bf16.mxu0 %vm1004_vm1, %v1003_v5 }
 0x4b8   : > { %v438_v55 = vpop.f32.mrb[4].mxu0 }
 0x4b9   : > { %v445_v56 = vsub.f32 %v444_v54, %v438_v55  ;;  %v790_v57 = vpop.f32.mrb[5].mxu0 }
 0x4ba   : > { %v441_v58 = vpop.f32.mrb[6].mxu0 }
 0x4bb   : > { %v446_v59 = vmul.f32 0.1625, %v445_v56  ;;  %v791_v60 = vpop.f32.mrb[7].mxu0 }
 0x4bd   : > { %v447_v61 = vadd.f32 %v446_v59, %v399_v51 }
 0x4bf   : > { %v448_v62 = vmul.f32 %v447_v61, %v447_v61 }
 0x4c1   : > { %449 = vadd.xlane.f32.xlu1 %v448_v62 }
 0x54e   : > { %v450_v63 = vpop.xlane.xlu1 %449 }
 0x54f   : > { %v451_v0 = vmax.f32 %v450_v63, 1e-24 }
 0x551   : > { %866 = vrsqrt.f32 %v451_v0 }
 0x55b   : > { %v867_v2 = vpop.eup %866 }
 0x55c   : > { %v453_v4 = vmul.f32 %v867_v2, %v447_v61 }
 0x55e   : > { %v460_v6 = vsel %vm459_vm10, %v453_v4, %v399_v51 }
 0x55f   : > { %v461_v5 = vpack.c.bf16 %v460_v6, %v460_v6  ;;  %v505_v8 = vmul.f32 %v460_v6, %v1178_v13 }
 0x561   : > { %v463_v7 = vsel %vm278_vm2, %v461_v5, 0 }
 0x562   : > { %793 = vmatpush3.bf16.msra.mxu1 %v463_v7 }
 0x565   : > { %795 = vmatmul.mubr.msk.bf16.vlgmr.msra.gmra.mrb[4].mxu1 %vm269_vm0, %v1156_v1 }
 0x638   : > { %v499_v9 = vpop.f32.mrb[4].mxu1 }
 0x639   : > { %v506_v10 = vsub.f32 %v505_v8, %v499_v9  ;;  %v796_v11 = vpop.f32.mrb[5].mxu1 }
 0x63a   : > { %v502_v12 = vpop.f32.mrb[6].mxu1 }
 0x63b   : > { %v507_v14 = vmul.f32 0.1625, %v506_v10  ;;  %v797_v15 = vpop.f32.mrb[7].mxu1 }
 0x63d   : > { %v508_v16 = vadd.f32 %v507_v14, %v460_v6 }
 0x63f   : > { %v509_v17 = vmul.f32 %v508_v16, %v508_v16 }
 0x641   : > { %510 = vadd.xlane.f32.xlu1 %v509_v17 }
 0x6ce   : > { %v511_v18 = vpop.xlane.xlu1 %510 }
 0x6cf   : > { %v512_v19 = vmax.f32 %v511_v18, 1e-24 }
 0x6d1   : > { %868 = vrsqrt.f32 %v512_v19 }
 0x6db   : > { %v869_v21 = vpop.eup %868 }
 0x6dc   : > { %v514_v22 = vmul.f32 %v869_v21, %v508_v16 }
 0x6de   : > { %v521_v23 = vsel %vm520_vm11, %v514_v22, %v460_v6 }
 0x6df   : > { %v522_v24 = vpack.c.bf16 %v521_v23, %v521_v23  ;;  %v566_v26 = vmul.f32 %v521_v23, %v1178_v13 }
 0x6e1   : > { %v524_v25 = vsel %vm278_vm2, %v522_v24, 0 }
 0x6e2   : > { %799 = vmatpush3.bf16.msra.mxu0 %v524_v25 }
 0x6e5   : > { %801 = vmatmul.mubr.msk.bf16.vlgmr.msra.gmra.mrb[8].mxu0 %vm269_vm0, %v1156_v1 }
 0x7b8   : > { %v560_v27 = vpop.f32.mrb[8].mxu0 }
 0x7b9   : > { %v567_v28 = vsub.f32 %v566_v26, %v560_v27  ;;  %v802_v29 = vpop.f32.mrb[9].mxu0 }
 0x7ba   : > { %v563_v30 = vpop.f32.mrb[10].mxu0 }
 0x7bb   : > { %v568_v31 = vmul.f32 0.1625, %v567_v28  ;;  %v803_v32 = vpop.f32.mrb[11].mxu0 }
 0x7bd   : > { %v569_v33 = vadd.f32 %v568_v31, %v521_v23 }
 0x7bf   : > { %v570_v34 = vmul.f32 %v569_v33, %v569_v33 }
 0x7c1   : > { %571 = vadd.xlane.f32.xlu1 %v570_v34 }
 0x7c2   : > { %915 = shalt.err (!%p912_p5)
}
 0x7c3   : > { %s916_s20 = scalar_lea.hbm %s1214_s9, 128  ;;  %s920_s25 = scalar_lea.hbm %s1290_s4, 256 }
 0x7c4   : > { %p917_p8 = scmp.ne.s32.totalorder %s1214_s9, %s916_s20  ;;  %p921_p1 = scmp.lt.u32.totalorder %s1214_s9, %s1290_s4 }
 0x7c5   : > { %p922_p3 = scmp.lt.u32.totalorder %s920_s25, %s916_s20  ;;  %p924_p6 = scmp.lt.u32.totalorder %s916_s20, %s1214_s9 }
 0x7c6   : > { %p918_p9 = pnand %p917_p8, %p1299_p12 }
 0x7c7   : > { %p923_p11 = por %p922_p3, %p921_p1 }
 0x7c8   : > { %p919_p0 = pneg %p918_p9 }
 0x7c9   : > { %p925_p13 = por %p924_p6, %p923_p11 }
 0x7cb   : > { %p926_p7 = pnand %p925_p13, %p919_p0 }
 0x7cd   : > { %929 = shalt.err (!%p926_p7)
}
 0x7ce   : > { %807 = dma.vmem_to_hbm [thread:$0]  (%p1299_p12), %s617_s13, 128, %s1214_s9, %s590_s14   ;;  %v580_v35 = vpop.permute.xlu0 %579 }
 0x7cf   : > { %s242_s6 = scalar_lea.vmem [#allocation5], %s749_s26  ;;  %vm581_vm12 = vcmp.eq.s32.totalorder %v580_v35, 1  ;;  %s1242_s12 = scalar_lea.hbm %s1289_s3, %s760_s30 }
 0x7d0   : > { %s603_s8 = sshll.u32 %s242_s6, 4  ;;  %s585_s9 = scalar_lea.sflag [#allocation4], %s1138_s7  ;;  %s1244_s8 = int_to_ptr.vmem [resolvable:$true] %s603_s8 }
 0x7d1   : > { %s930_s13 = scalar_lea.vmem %s1244_s8, 128  ;;  %s1007_s26 = smov [#allocation5]  }
 0x7d2   : > { %p931_p10 = scmp.ne.s32.totalorder %s1244_s8, %s930_s13  ;;  %s934_s19 = sshll.u32 %s1007_s26, 4  ;;  %s935_s19 = int_to_ptr.vmem [resolvable:$false] %s934_s19 }
 0x7d3   : > { %s936_s14 = scalar_lea.vmem %s935_s19, 256  ;;  %p937_p5 = scmp.lt.s32.totalorder %s1244_s8, %s935_s19 }
 0x7d4   : > { %p932_p2 = pnand %p931_p10, %p1299_p12  ;;  %p938_p8 = scmp.lt.s32.totalorder %s936_s14, %s930_s13 }
 0x7d6   : > { %p933_p4 = pneg %p932_p2  ;;  %p939_p9 = por %p938_p8, %p937_p5 }
 0x7d8   : > { %p940_p0 = pnand %p939_p9, %p933_p4 }
 0x84e   : > { %v572_v1 = vpop.xlane.xlu1 %571 }
 0x84f   : > { %v573_v13 = vmax.f32 %v572_v1, 1e-24 }
 0x851   : > { %870 = vrsqrt.f32 %v573_v13 }
 0x85b   : > { %v871_v36 = vpop.eup %870 }
 0x85c   : > { %v575_v37 = vmul.f32 %v871_v36, %v569_v33 }
 0x85e   : > { %v582_v38 = vsel %vm581_vm12, %v575_v37, %v521_v23 }
 0x85f   : > { %583 = vst [vmem:[%s242_s6] sm:$0xff] %v582_v38 }
 0x860   : > { %943 = shalt.err (!%p940_p0)
}
 0x861   : > { %s944_s7 = scalar_lea.hbm %s1242_s12, 128  ;;  %s948_s22 = scalar_lea.hbm %s1289_s3, 256 }
 0x862   : > { %p945_p1 = scmp.ne.s32.totalorder %s1242_s12, %s944_s7  ;;  %p949_p6 = scmp.lt.u32.totalorder %s1242_s12, %s1289_s3 }
 0x863   : > { %p950_p13 = scmp.lt.u32.totalorder %s948_s22, %s944_s7  ;;  %p952_p10 = scmp.lt.u32.totalorder %s944_s7, %s1242_s12 }
 0x864   : > { %p946_p3 = pnand %p945_p1, %p1299_p12 }
 0x865   : > { %p951_p7 = por %p950_p13, %p949_p6 }
 0x866   : > { %p947_p11 = pneg %p946_p3 }
 0x867   : > { %p953_p2 = por %p952_p10, %p951_p7 }
 0x869   : > { %p954_p4 = pnand %p953_p2, %p947_p11 }
 0x86b   : > { %957 = shalt.err (!%p954_p4)
}
 0x86c   : > { %806 = dma.vmem_to_hbm [thread:$0]  (%p1299_p12), %s1244_s8, 128, %s1242_s12, %s585_s9  }
 0x86d PF: > { %s628_s29 = sand.u32 1, %s988_s15   ;;  %p1300_p5 = scmp.ne.s32.totalorder %s1295_s28, 0 }
 0x86e   : > { %p1301_p8 = scmp.ge.s32.totalorder %s1000_s18, 2  ;;  %s629_s5 = scalar_lea.sflag [#allocation4], %s628_s29 }
 0x870   : > { %p815_p9 = pnand %p1301_p8, %p1300_p5 }
 0x872   : > { %979 = dma.done.wait (!%p815_p9), %s629_s5, 128  }
 0x873   : > { %981 = vsyncadd (!%p815_p9), %s629_s5, 4294967168  ;;  %s638_s6 = scalar_lea.sflag [#allocation7], %s628_s29 }
 0x874   : > { %983 = dma.done.wait (!%p815_p9), %s638_s6, 128  }
 0x875   : > { %985 = vsyncadd (!%p815_p9), %s638_s6, 4294967168  ;;  %p21_p12 = scmp.ge.s32.totalorder %s1058_s21, 4   ;;  %s1302_s15 = smov %s992_s16 }
 0x876   : > { %s1303_s16 = smov %s996_s17  ;;  %s1304_s17 = smov %s1070_s24 }
 0x877   : > { %s1305_s18 = smov %s1058_s21  ;;  %23 = sbr.rel (!%p21_p12) target bundleno = 7 (0x7), region = 100 }
 0x87e   :  { %643 = vsyncpa [#allocation3], 1 }
 0x87f   :  { %645 = vsyncpa [#allocation3 + $0x1], 1 }
 0x880   :  { %646 = vsyncpa [#allocation4], 1 }
 0x881   :  { %648 = vsyncpa [#allocation4 + $0x1], 1 }
 0x882   :  { %649 = vsyncpa [#allocation7], 1 }
 0x883   :  { %651 = vsyncpa [#allocation7 + $0x1], 1 }

</bundles_post_ra>
